<compile_context>
chip_gen: v6e
topology: v6e:2x2x1
jax: 0.10.0
libtpu: 0.0.40
codegen_flags: <defaults>
</compile_context>

<pallas_src>
import numpy as np
import jax
import jax.numpy as jnp
from jax.experimental import pallas as pl
from jax.experimental.pallas import tpu as pltpu


def _banded_weights(w_oihw, Wdim, C):
    """Torch-layout conv weight (Cout, Cin, 3, 3) -> (3, W*C, W*C) banded mats.

    bw[kh, wi*C + cin, wo*C + cout] = w[cout, cin, kh, wi - wo + 1]
    for |wi - wo| <= 1, else 0.  A lane-dense row x[h, w*C + c] @ bw[kh]
    then realizes the kw-sum of the 3x3 conv for kernel row kh, including the
    zero padding along W (out-of-band entries are zero).
    """
    wk = jnp.transpose(w_oihw.astype(jnp.float32), (2, 3, 1, 0))  # (kh, kw, cin, cout)
    ind = np.zeros((3, Wdim, Wdim), np.float32)  # ind[kw, wi, wo] = 1 iff wi == wo + kw - 1
    for kw in range(3):
        for wo in range(Wdim):
            wi = wo + kw - 1
            if 0 <= wi < Wdim:
                ind[kw, wi, wo] = 1.0
    bw = jnp.einsum("kab,hkio->haibo", jnp.asarray(ind), wk)  # (kh, wi, cin, wo, cout)
    return bw.reshape(3, Wdim * C, Wdim * C)


def block_kernel(x_ref, bw1_ref, a1_ref, bw2_ref, a2_ref, o_ref):
    # x_ref : (1, H, W*C)   lane-dense input for one image (lane = w*C + c)
    # bw*   : (3, W*C, W*C) per-kh banded weight matrices
    # a*    : (1, W*C)      PReLU slopes pre-tiled over w
    # o_ref : (1, H, W*C)
    H = x_ref.shape[1]
    WC = x_ref.shape[2]

    x = x_ref[0]                     # (H, WC)
    a1 = a1_ref[...]                 # (1, WC)
    a2 = a2_ref[...]                 # (1, WC)

    row = jax.lax.broadcasted_iota(jnp.int32, (H, WC), 0)
    top = row == 0
    bot = row == H - 1

    def conv3x3(v, bw_ref):
        # kh = 1 (center kernel row)
        y = jnp.dot(v, bw_ref[1], preferred_element_type=jnp.float32)
        # kh = 0: output row h reads input row h-1 (zero above the top row)
        vm = jnp.where(top, 0.0, pltpu.roll(v, 1, axis=0))
        y = y + jnp.dot(vm, bw_ref[0], preferred_element_type=jnp.float32)
        # kh = 2: output row h reads input row h+1 (zero below the bottom row)
        vp = jnp.where(bot, 0.0, pltpu.roll(v, H - 1, axis=0))
        y = y + jnp.dot(vp, bw_ref[2], preferred_element_type=jnp.float32)
        return y

    y1 = conv3x3(x, bw1_ref)
    h1 = jnp.where(y1 > 0, y1, y1 * a1)      # PReLU1
    y2 = conv3x3(h1, bw2_ref)
    h2 = jnp.where(y2 > 0, y2, y2 * a2)      # PReLU2

    o_ref[0] = x + h2                        # residual add, reuses loaded x


@jax.jit
def block_forward(x_nchw, w1_oihw, alpha1, w2_oihw, alpha2):
    """x_nchw: (N, C, H, W); w*_oihw: (C, C, 3, 3) torch layout; alpha*: (C,)."""
    N, C, H, W = x_nchw.shape
    WC = W * C

    # NCHW -> NHWC -> lane-dense (N, H, W*C).
    # TODO(synk): at larger sizes fold the layout change + halo tiling into
    # BlockSpecs (and use bf16 on v6e/v7x) instead of whole-array wrapper ops.
    x_ld = jnp.transpose(x_nchw, (0, 2, 3, 1)).astype(jnp.float32).reshape(N, H, WC)

    bw1 = _banded_weights(w1_oihw, W, C)     # (3, WC, WC)
    bw2 = _banded_weights(w2_oihw, W, C)     # (3, WC, WC)
    a1 = jnp.tile(alpha1.astype(jnp.float32).reshape(1, C), (1, W))  # (1, WC)
    a2 = jnp.tile(alpha2.astype(jnp.float32).reshape(1, C), (1, W))  # (1, WC)

    out_ld = pl.pallas_call(
        block_kernel,
        out_shape=jax.ShapeDtypeStruct((N, H, WC), jnp.float32),
        grid_spec=pltpu.PrefetchScalarGridSpec(
            num_scalar_prefetch=0,
            grid=(N,),
            in_specs=[
                pl.BlockSpec((1, H, WC), lambda n: (n, 0, 0)),
                pl.BlockSpec((3, WC, WC), lambda n: (0, 0, 0)),
                pl.BlockSpec((1, WC), lambda n: (0, 0)),
                pl.BlockSpec((3, WC, WC), lambda n: (0, 0, 0)),
                pl.BlockSpec((1, WC), lambda n: (0, 0)),
            ],
            out_specs=pl.BlockSpec((1, H, WC), lambda n: (n, 0, 0)),
        ),
        compiler_params=pltpu.CompilerParams(
            dimension_semantics=("parallel",),
        ),
    )(x_ld, bw1, a1, bw2, a2)

    return jnp.transpose(out_ld.reshape(N, H, W, C), (0, 3, 1, 2))


def block_reference(x, w1, a1, w2, a2):
    """Pure-JAX reference matching PyTorch semantics (NCHW)."""
    def conv(v, w):
        return jax.lax.conv_general_dilated(
            v, w, window_strides=(1, 1), padding=((1, 1), (1, 1)),
            dimension_numbers=("NCHW", "OIHW", "NCHW"))

    def prelu(v, a):
        a = a.reshape(1, -1, 1, 1)
        return jnp.where(v > 0, v, v * a)

    h = prelu(conv(x, w1), a1)
    h = prelu(conv(h, w2), a2)
    return x + h


if __name__ == "__main__":
    N, C, H, W = 2, 8, 16, 16   # planes = 8  ->  W*C = 128 (one full lane group)

    key = jax.random.PRNGKey(0)
    kx, kw1, kw2, ka1, ka2 = jax.random.split(key, 5)

    x = jax.random.normal(kx, (N, C, H, W), dtype=jnp.float32)
    fan_in_std = (2.0 / (C * 9)) ** 0.5
    w1 = jax.random.normal(kw1, (C, C, 3, 3), dtype=jnp.float32) * fan_in_std
    w2 = jax.random.normal(kw2, (C, C, 3, 3), dtype=jnp.float32) * fan_in_std
    alpha1 = jax.random.uniform(ka1, (C,), jnp.float32, 0.1, 0.5)  # PReLU slopes
    alpha2 = jax.random.uniform(ka2, (C,), jnp.float32, 0.1, 0.5)

    out = jax.block_until_ready(block_forward(x, w1, alpha1, w2, alpha2))
    ref = jax.block_until_ready(block_reference(x, w1, alpha1, w2, alpha2))

    assert out.shape == (N, C, H, W)
    assert jnp.allclose(out, ref, atol=5e-4, rtol=5e-4), "mismatch vs reference"

    print("KERNEL_OK")
</pallas_src>

<mosaic_0001>
module attributes {stable_mosaic.version = 11 : i64} {
  func.func @block_kernel(%arg0: i32, %arg1: memref<1x16x128xf32, #tpu.memory_space<vmem>>, %arg2: memref<3x128x128xf32, #tpu.memory_space<vmem>>, %arg3: memref<1x128xf32, #tpu.memory_space<vmem>>, %arg4: memref<3x128x128xf32, #tpu.memory_space<vmem>>, %arg5: memref<1x128xf32, #tpu.memory_space<vmem>>, %arg6: memref<1x16x128xf32, #tpu.memory_space<vmem>>) attributes {dimension_semantics = [#tpu.dimension_semantics<parallel>], iteration_bounds = array<i64: 2>, scalar_prefetch = 0 : i64, scratch_operands = 0 : i64, tpu.core_type = #tpu.core_type<tc>, window_params = [{transform_indices = @transform_0, window_bounds = array<i64: 1, 16, 128>}, {pipeline_mode = #tpu.pipeline_mode<synchronous>, transform_indices = @transform_1, window_bounds = array<i64: 3, 128, 128>}, {pipeline_mode = #tpu.pipeline_mode<synchronous>, transform_indices = @transform_2, window_bounds = array<i64: 1, 128>}, {pipeline_mode = #tpu.pipeline_mode<synchronous>, transform_indices = @transform_3, window_bounds = array<i64: 3, 128, 128>}, {pipeline_mode = #tpu.pipeline_mode<synchronous>, transform_indices = @transform_4, window_bounds = array<i64: 1, 128>}, {transform_indices = @transform_5, window_bounds = array<i64: 1, 16, 128>}]} {
    %c0 = arith.constant 0 : index
    %c0_0 = arith.constant 0 : index
    %c0_1 = arith.constant 0 : index
    %0 = vector.load %arg1[%c0, %c0_0, %c0_1] : memref<1x16x128xf32, #tpu.memory_space<vmem>>, vector<1x16x128xf32>
    %1 = vector.shape_cast %0 : vector<1x16x128xf32> to vector<16x128xf32>
    %c0_2 = arith.constant 0 : index
    %c0_3 = arith.constant 0 : index
    %2 = vector.load %arg3[%c0_2, %c0_3] : memref<1x128xf32, #tpu.memory_space<vmem>>, vector<1x128xf32>
    %c0_4 = arith.constant 0 : index
    %c0_5 = arith.constant 0 : index
    %3 = vector.load %arg5[%c0_4, %c0_5] : memref<1x128xf32, #tpu.memory_space<vmem>>, vector<1x128xf32>
    %4 = tpu.iota {dimensions = array<i32: 0>} : vector<16x128xi32>
    %c0_i32 = arith.constant 0 : i32
    %5 = vector.broadcast %c0_i32 : i32 to vector<16x128xi32>
    %6 = arith.cmpi eq, %4, %5 : vector<16x128xi32>
    %c15_i32 = arith.constant 15 : i32
    %7 = vector.broadcast %c15_i32 : i32 to vector<16x128xi32>
    %8 = arith.cmpi eq, %4, %7 : vector<16x128xi32>
    %c1 = arith.constant 1 : index
    %c0_6 = arith.constant 0 : index
    %c0_7 = arith.constant 0 : index
    %9 = vector.load %arg2[%c1, %c0_6, %c0_7] : memref<3x128x128xf32, #tpu.memory_space<vmem>>, vector<1x128x128xf32>
    %10 = vector.shape_cast %9 : vector<1x128x128xf32> to vector<128x128xf32>
    %cst = arith.constant dense<0.000000e+00> : vector<16x128xf32>
    %11 = tpu.matmul %1, %10, %cst {dimension_numbers = #tpu.dot_dimension_numbers<[1], [0], [0], [1], [0, 0, 1, 1], [], []>} : vector<16x128xf32>, vector<128x128xf32>, vector<16x128xf32> -> vector<16x128xf32>
    %c1_i32 = arith.constant 1 : i32
    %12 = tpu.dynamic_rotate %1 by %c1_i32 dim 0 : vector<16x128xf32>, i32 -> vector<16x128xf32>
    %cst_8 = arith.constant 0.000000e+00 : f32
    %13 = vector.broadcast %cst_8 : f32 to vector<16x128xf32>
    %14 = arith.select %6, %13, %12 : vector<16x128xi1>, vector<16x128xf32>
    %c0_9 = arith.constant 0 : index
    %c0_10 = arith.constant 0 : index
    %c0_11 = arith.constant 0 : index
    %15 = vector.load %arg2[%c0_9, %c0_10, %c0_11] : memref<3x128x128xf32, #tpu.memory_space<vmem>>, vector<1x128x128xf32>
    %16 = vector.shape_cast %15 : vector<1x128x128xf32> to vector<128x128xf32>
    %cst_12 = arith.constant dense<0.000000e+00> : vector<16x128xf32>
    %17 = tpu.matmul %14, %16, %cst_12 {dimension_numbers = #tpu.dot_dimension_numbers<[1], [0], [0], [1], [0, 0, 1, 1], [], []>} : vector<16x128xf32>, vector<128x128xf32>, vector<16x128xf32> -> vector<16x128xf32>
    %18 = arith.addf %11, %17 : vector<16x128xf32>
    %c15_i32_13 = arith.constant 15 : i32
    %19 = tpu.dynamic_rotate %1 by %c15_i32_13 dim 0 : vector<16x128xf32>, i32 -> vector<16x128xf32>
    %cst_14 = arith.constant 0.000000e+00 : f32
    %20 = vector.broadcast %cst_14 : f32 to vector<16x128xf32>
    %21 = arith.select %8, %20, %19 : vector<16x128xi1>, vector<16x128xf32>
    %c2 = arith.constant 2 : index
    %c0_15 = arith.constant 0 : index
    %c0_16 = arith.constant 0 : index
    %22 = vector.load %arg2[%c2, %c0_15, %c0_16] : memref<3x128x128xf32, #tpu.memory_space<vmem>>, vector<1x128x128xf32>
    %23 = vector.shape_cast %22 : vector<1x128x128xf32> to vector<128x128xf32>
    %cst_17 = arith.constant dense<0.000000e+00> : vector<16x128xf32>
    %24 = tpu.matmul %21, %23, %cst_17 {dimension_numbers = #tpu.dot_dimension_numbers<[1], [0], [0], [1], [0, 0, 1, 1], [], []>} : vector<16x128xf32>, vector<128x128xf32>, vector<16x128xf32> -> vector<16x128xf32>
    %25 = arith.addf %18, %24 : vector<16x128xf32>
    %cst_18 = arith.constant 0.000000e+00 : f32
    %26 = vector.broadcast %cst_18 : f32 to vector<16x128xf32>
    %27 = arith.cmpf ogt, %25, %26 : vector<16x128xf32>
    %28 = vector.broadcast %2 : vector<1x128xf32> to vector<16x128xf32>
    %29 = arith.mulf %25, %28 : vector<16x128xf32>
    %30 = arith.select %27, %25, %29 : vector<16x128xi1>, vector<16x128xf32>
    %c1_19 = arith.constant 1 : index
    %c0_20 = arith.constant 0 : index
    %c0_21 = arith.constant 0 : index
    %31 = vector.load %arg4[%c1_19, %c0_20, %c0_21] : memref<3x128x128xf32, #tpu.memory_space<vmem>>, vector<1x128x128xf32>
    %32 = vector.shape_cast %31 : vector<1x128x128xf32> to vector<128x128xf32>
    %cst_22 = arith.constant dense<0.000000e+00> : vector<16x128xf32>
    %33 = tpu.matmul %30, %32, %cst_22 {dimension_numbers = #tpu.dot_dimension_numbers<[1], [0], [0], [1], [0, 0, 1, 1], [], []>} : vector<16x128xf32>, vector<128x128xf32>, vector<16x128xf32> -> vector<16x128xf32>
    %c1_i32_23 = arith.constant 1 : i32
    %34 = tpu.dynamic_rotate %30 by %c1_i32_23 dim 0 : vector<16x128xf32>, i32 -> vector<16x128xf32>
    %cst_24 = arith.constant 0.000000e+00 : f32
    %35 = vector.broadcast %cst_24 : f32 to vector<16x128xf32>
    %36 = arith.select %6, %35, %34 : vector<16x128xi1>, vector<16x128xf32>
    %c0_25 = arith.constant 0 : index
    %c0_26 = arith.constant 0 : index
    %c0_27 = arith.constant 0 : index
    %37 = vector.load %arg4[%c0_25, %c0_26, %c0_27] : memref<3x128x128xf32, #tpu.memory_space<vmem>>, vector<1x128x128xf32>
    %38 = vector.shape_cast %37 : vector<1x128x128xf32> to vector<128x128xf32>
    %cst_28 = arith.constant dense<0.000000e+00> : vector<16x128xf32>
    %39 = tpu.matmul %36, %38, %cst_28 {dimension_numbers = #tpu.dot_dimension_numbers<[1], [0], [0], [1], [0, 0, 1, 1], [], []>} : vector<16x128xf32>, vector<128x128xf32>, vector<16x128xf32> -> vector<16x128xf32>
    %40 = arith.addf %33, %39 : vector<16x128xf32>
    %c15_i32_29 = arith.constant 15 : i32
    %41 = tpu.dynamic_rotate %30 by %c15_i32_29 dim 0 : vector<16x128xf32>, i32 -> vector<16x128xf32>
    %cst_30 = arith.constant 0.000000e+00 : f32
    %42 = vector.broadcast %cst_30 : f32 to vector<16x128xf32>
    %43 = arith.select %8, %42, %41 : vector<16x128xi1>, vector<16x128xf32>
    %c2_31 = arith.constant 2 : index
    %c0_32 = arith.constant 0 : index
    %c0_33 = arith.constant 0 : index
    %44 = vector.load %arg4[%c2_31, %c0_32, %c0_33] : memref<3x128x128xf32, #tpu.memory_space<vmem>>, vector<1x128x128xf32>
    %45 = vector.shape_cast %44 : vector<1x128x128xf32> to vector<128x128xf32>
    %cst_34 = arith.constant dense<0.000000e+00> : vector<16x128xf32>
    %46 = tpu.matmul %43, %45, %cst_34 {dimension_numbers = #tpu.dot_dimension_numbers<[1], [0], [0], [1], [0, 0, 1, 1], [], []>} : vector<16x128xf32>, vector<128x128xf32>, vector<16x128xf32> -> vector<16x128xf32>
    %47 = arith.addf %40, %46 : vector<16x128xf32>
    %cst_35 = arith.constant 0.000000e+00 : f32
    %48 = vector.broadcast %cst_35 : f32 to vector<16x128xf32>
    %49 = arith.cmpf ogt, %47, %48 : vector<16x128xf32>
    %50 = vector.broadcast %3 : vector<1x128xf32> to vector<16x128xf32>
    %51 = arith.mulf %47, %50 : vector<16x128xf32>
    %52 = arith.select %49, %47, %51 : vector<16x128xi1>, vector<16x128xf32>
    %53 = arith.addf %1, %52 : vector<16x128xf32>
    %c0_36 = arith.constant 0 : index
    %c0_37 = arith.constant 0 : index
    %c0_38 = arith.constant 0 : index
    %54 = vector.load %arg6[%c0_36, %c0_37, %c0_38] : memref<1x16x128xf32, #tpu.memory_space<vmem>>, vector<1x16x128xf32>
    %55 = vector.shape_cast %54 : vector<1x16x128xf32> to vector<16x128xf32>
    %56 = vector.shape_cast %53 : vector<16x128xf32> to vector<1x16x128xf32>
    tpu.vector_store %arg6[%c0_36, %c0_37, %c0_38], %56 {strides = array<i32>} : memref<1x16x128xf32, #tpu.memory_space<vmem>>, vector<1x16x128xf32>,
    return
  }
  func.func @transform_0(%arg0: i32) -> (i32, i32, i32) {
    %c0_i32 = arith.constant 0 : i32
    %c0_i32_0 = arith.constant 0 : i32
    %c0_i32_1 = arith.constant 0 : i32
    return %arg0, %c0_i32, %c0_i32_0 : i32, i32, i32
  }
  func.func @transform_1(%arg0: i32) -> (i32, i32, i32) {
    %c0_i32 = arith.constant 0 : i32
    %c0_i32_0 = arith.constant 0 : i32
    %c0_i32_1 = arith.constant 0 : i32
    %c0_i32_2 = arith.constant 0 : i32
    return %c0_i32, %c0_i32_0, %c0_i32_1 : i32, i32, i32
  }
  func.func @transform_2(%arg0: i32) -> (i32, i32) {
    %c0_i32 = arith.constant 0 : i32
    %c0_i32_0 = arith.constant 0 : i32
    %c0_i32_1 = arith.constant 0 : i32
    return %c0_i32, %c0_i32_0 : i32, i32
  }
  func.func @transform_3(%arg0: i32) -> (i32, i32, i32) {
    %c0_i32 = arith.constant 0 : i32
    %c0_i32_0 = arith.constant 0 : i32
    %c0_i32_1 = arith.constant 0 : i32
    %c0_i32_2 = arith.constant 0 : i32
    return %c0_i32, %c0_i32_0, %c0_i32_1 : i32, i32, i32
  }
  func.func @transform_4(%arg0: i32) -> (i32, i32) {
    %c0_i32 = arith.constant 0 : i32
    %c0_i32_0 = arith.constant 0 : i32
    %c0_i32_1 = arith.constant 0 : i32
    return %c0_i32, %c0_i32_0 : i32, i32
  }
  func.func @transform_5(%arg0: i32) -> (i32, i32, i32) {
    %c0_i32 = arith.constant 0 : i32
    %c0_i32_0 = arith.constant 0 : i32
    %c0_i32_1 = arith.constant 0 : i32
    return %arg0, %c0_i32, %c0_i32_0 : i32, i32, i32
  }
}

</mosaic_0001>

<bundles_post_ra>
// kernel: block_forward.1
= control target key start
LH: loop header
LB: loop body
LE: loop exit
PB: predicated region body
PF: predicated region fallthrough
CT: control target
= control target key end

     0   :  { %s1352_s18 = smov 0   ;;  %s1727_s0 = inlined_call_operand.vmem [shape: f32[2,16,128], index: 0, kind: input, shape index: {}]   ;;  %s1728_s1 = inlined_call_operand.vmem [shape: f32[3,128,128], index: 1, kind: input, shape index: {}]   ;;  %s1729_s2 = inlined_call_operand.vmem [shape: f32[1,128], index: 2, kind: input, shape index: {}]   ;;  %s1730_s3 = inlined_call_operand.vmem [shape: f32[3,128,128], index: 3, kind: input, shape index: {}]   ;;  %s1731_s4 = inlined_call_operand.vmem [shape: f32[1,128], index: 4, kind: input, shape index: {}]   ;;  %s1732_s5 = inlined_call_operand.vmem [shape: f32[2,16,128], index: 5, kind: output, shape index: {}]  }
   0x1 LB: > { %s899_s19 = sadd.s32 4294967295, %s1320_s18   ;;  %p903_p0 = scmp.ge.s32.totalorder %s1320_s18, 1  ;;  %s1320_s18 = sphi %s1352_s18, %s15_s18  }
   0x2   : > { %p187_p1 = scmp.lt.s32.totalorder %s1320_s18, 3 }
   0x4   : > { %p188_p2 = pnand %p903_p0, %p187_p1 }
   0x5   : > { %p215_p3 = scmp.lt.s32.totalorder (!%p188_p2), %s899_s19, 1 }
   0x6   : > { %191 = sbr.rel (%p188_p2) target bundleno = 517 (0x205), region = 40 }
   0xb   : > { %v275_v0 = vld [vmem:[%s1728_s1 + $0x78] sm:$0xff]  ;;  %v274_v2 = vld [vmem:[%s1728_s1 + $0x70] sm:$0xff]  ;;  %v273_v4 = vld [vmem:[%s1728_s1 + $0x68] sm:$0xff]  ;;  %s1734_s19 = smov (!%p215_p3, %s899_s19), 1  ;;  %v229_v22 = vlaneseq }
   0xc   : > { %v923_v1 = vld [vmem:[%s1728_s1 + $0xf8] sm:$0xff]  ;;  %1096 = vmatprep.subr.mxu0 %v275_v0  ;;  %v922_v3 = vld [vmem:[%s1728_s1 + $0xf0] sm:$0xff]  ;;  %v921_v5 = vld [vmem:[%s1728_s1 + $0xe8] sm:$0xff]  ;;  %s984_s12 = sshll.u32 %s1734_s19, 4 }
   0xd   : > { %1131 = vmatprep.subr.mxu1 %v923_v1  ;;  %1097 = vmatpush3.msra.mxu0 %v275_v0  ;;  %v272_v6 = vld [vmem:[%s1728_s1 + $0x60] sm:$0xff]  ;;  %v271_v8 = vld [vmem:[%s1728_s1 + $0x58] sm:$0xff]  ;;  %v270_v10 = vld [vmem:[%s1728_s1 + $0x50] sm:$0xff]  ;;  %s219_s21 = scalar_lea.vmem %s1727_s0, %s984_s12  ;;  %v1454_v29 = vshrl.u32 %v229_v22, 7  ;;  %s224_s22 = scalar_lea.vmem %s1732_s5, %s984_s12 }
   0xe   : > { %1132 = vmatpush3.msra.mxu1 %v923_v1  ;;  %1098 = vmatprep.subr.mxu0 %v274_v2  ;;  %v920_v7 = vld [vmem:[%s1728_s1 + $0xe0] sm:$0xff]  ;;  %v919_v9 = vld [vmem:[%s1728_s1 + $0xd8] sm:$0xff]  ;;  %v918_v11 = vld [vmem:[%s1728_s1 + $0xd0] sm:$0xff] }
   0xf   : > { %1133 = vmatprep.subr.mxu1 %v922_v3  ;;  %1099 = vmatpush3.msra.mxu0 %v274_v2  ;;  %v269_v12 = vld [vmem:[%s1728_s1 + $0x48] sm:$0xff]  ;;  %v268_v14 = vld [vmem:[%s1728_s1 + $0x40] sm:$0xff]  ;;  %v267_v16 = vld [vmem:[%s1728_s1 + $0x38] sm:$0xff]  ;;  %vm255_vm0 = vcmp.lt.s32.totalorder %v1454_v29, 1  ;;  %vm986_vm1 = vcmp.ne.s32.totalorder %v1454_v29, 0  ;;  %vm428_vm2 = vcmp.lt.s32.totalorder %v1454_v29, 7 }
  0x10   : > { %1134 = vmatpush3.msra.mxu1 %v922_v3  ;;  %1100 = vmatprep.subr.mxu0 %v273_v4  ;;  %v917_v13 = vld [vmem:[%s1728_s1 + $0xc8] sm:$0xff]  ;;  %v916_v15 = vld [vmem:[%s1728_s1 + $0xc0] sm:$0xff]  ;;  %v915_v17 = vld [vmem:[%s1728_s1 + $0xb8] sm:$0xff]  ;;  %v1541_v58 = vadd.s32 8, %v1454_v29 }
  0x11   : > { %1135 = vmatprep.subr.mxu1 %v921_v5  ;;  %1101 = vmatpush3.msra.mxu0 %v273_v4  ;;  %v266_v18 = vld [vmem:[%s1728_s1 + $0x30] sm:$0xff]  ;;  %v265_v20 = vld [vmem:[%s1728_s1 + $0x28] sm:$0xff]  ;;  %v264_v23 = vld [vmem:[%s1728_s1 + $0x20] sm:$0xff] }
  0x12   : > { %1136 = vmatpush3.msra.mxu1 %v921_v5  ;;  %1102 = vmatprep.subr.mxu0 %v272_v6  ;;  %v914_v19 = vld [vmem:[%s1728_s1 + $0xb0] sm:$0xff]  ;;  %v913_v21 = vld [vmem:[%s1728_s1 + $0xa8] sm:$0xff]  ;;  %v912_v24 = vld [vmem:[%s1728_s1 + $0xa0] sm:$0xff]  ;;  %vm987_vm3 = vcmp.ne.s32.totalorder %v1541_v58, 15 }
  0x13   : > { %1137 = vmatprep.subr.mxu1 %v920_v7  ;;  %1103 = vmatpush3.msra.mxu0 %v272_v6  ;;  %v263_v25 = vld [vmem:[%s1728_s1 + $0x18] sm:$0xff]  ;;  %v1450_v27 = vld [vmem:[%s219_s21] sm:$0xff]  ;;  %v1452_v28 = vld [vmem:[%s219_s21 + $0x8] sm:$0xff] }
  0x14   : > { %1138 = vmatpush3.msra.mxu1 %v920_v7  ;;  %1104 = vmatprep.subr.mxu0 %v271_v8  ;;  %v911_v26 = vld [vmem:[%s1728_s1 + $0x98] sm:$0xff]  ;;  %v262_v30 = vld [vmem:[%s1728_s1 + $0x10] sm:$0xff]  ;;  %v253_v32 = vrot.slane %v1450_v27, 7  ;;  %v254_v33 = vrot.slane %v1452_v28, 7  ;;  %v261_v34 = vld [vmem:[%s1728_s1 + $0x8] sm:$0xff]  ;;  %v426_v38 = vrot.slane %v1450_v27, 1 }
  0x15   : > { %1139 = vmatprep.subr.mxu1 %v919_v9  ;;  %1105 = vmatpush3.msra.mxu0 %v271_v8  ;;  %v910_v31 = vld [vmem:[%s1728_s1 + $0x90] sm:$0xff]  ;;  %v909_v35 = vld [vmem:[%s1728_s1 + $0x88] sm:$0xff]  ;;  %v260_v36 = vld [vmem:[%s1728_s1] sm:$0xff]  ;;  %v427_v39 = vrot.slane %v1452_v28, 1 }
  0x16   : > { %1140 = vmatpush3.msra.mxu1 %v919_v9  ;;  %1106 = vmatprep.subr.mxu0 %v270_v10  ;;  %v908_v37 = vld [vmem:[%s1728_s1 + $0x80] sm:$0xff]  ;;  %v257_v40 = vsel %vm255_vm0, %v254_v33, %v253_v32  ;;  %v256_v41 = vsel %vm255_vm0, %v253_v32, %v254_v33  ;;  %v941_v42 = vld [vmem:[%s1728_s1 + $0x178] sm:$0xff]  ;;  %v940_v44 = vld [vmem:[%s1728_s1 + $0x170] sm:$0xff] }
  0x17   : > { %1141 = vmatprep.subr.mxu1 %v918_v11  ;;  %1107 = vmatpush3.msra.mxu0 %v270_v10  ;;  %v429_v43 = vsel %vm428_vm2, %v426_v38, %v427_v39  ;;  %v939_v45 = vld [vmem:[%s1728_s1 + $0x168] sm:$0xff]  ;;  %v938_v46 = vld [vmem:[%s1728_s1 + $0x160] sm:$0xff]  ;;  %v937_v47 = vld [vmem:[%s1728_s1 + $0x158] sm:$0xff]  ;;  %v430_v60 = vsel %vm428_vm2, %v427_v39, %v426_v38 }
  0x18   : > { %1142 = vmatpush3.msra.mxu1 %v918_v11  ;;  %1108 = vmatprep.subr.mxu0 %v269_v12  ;;  %v936_v48 = vld [vmem:[%s1728_s1 + $0x150] sm:$0xff]  ;;  %v935_v49 = vld [vmem:[%s1728_s1 + $0x148] sm:$0xff]  ;;  %v934_v50 = vld [vmem:[%s1728_s1 + $0x140] sm:$0xff] }
  0x19   : > { %1143 = vmatprep.subr.mxu1 %v917_v13  ;;  %1109 = vmatpush3.msra.mxu0 %v269_v12  ;;  %v933_v51 = vld [vmem:[%s1728_s1 + $0x138] sm:$0xff]  ;;  %v932_v52 = vld [vmem:[%s1728_s1 + $0x130] sm:$0xff]  ;;  %v931_v53 = vld [vmem:[%s1728_s1 + $0x128] sm:$0xff] }
  0x1a   : > { %1144 = vmatpush3.msra.mxu1 %v917_v13  ;;  %1110 = vmatprep.subr.mxu0 %v268_v14  ;;  %v930_v54 = vld [vmem:[%s1728_s1 + $0x120] sm:$0xff]  ;;  %v929_v55 = vld [vmem:[%s1728_s1 + $0x118] sm:$0xff]  ;;  %v928_v56 = vld [vmem:[%s1728_s1 + $0x110] sm:$0xff] }
  0x1b   : > { %1145 = vmatprep.subr.mxu1 %v916_v15  ;;  %1111 = vmatpush3.msra.mxu0 %v268_v14  ;;  %v927_v57 = vld [vmem:[%s1728_s1 + $0x108] sm:$0xff]  ;;  %v926_v59 = vld [vmem:[%s1728_s1 + $0x100] sm:$0xff]  ;;  %v960_v61 = vld [vmem:[%s1730_s3 + $0xf8] sm:$0xff] }
  0x1c   : > { %1146 = vmatpush3.msra.mxu1 %v916_v15  ;;  %1112 = vmatprep.subr.mxu0 %v267_v16  ;;  %v577_v62 = vld [vmem:[%s1730_s3 + $0x78] sm:$0xff]  ;;  %v959_v63 = vld [vmem:[%s1730_s3 + $0xf0] sm:$0xff]  ;;  %v958_v1 = vld [vmem:[%s1730_s3 + $0xe8] sm:$0xff] }
  0x1d   : > { %1147 = vmatprep.subr.mxu1 %v915_v17  ;;  %1113 = vmatpush3.msra.mxu0 %v267_v16  ;;  %v576_v0 = vld [vmem:[%s1730_s3 + $0x70] sm:$0xff]  ;;  %v575_v2 = vld [vmem:[%s1730_s3 + $0x68] sm:$0xff]  ;;  %v957_v3 = vld [vmem:[%s1730_s3 + $0xe0] sm:$0xff] }
  0x1e   : > { %1148 = vmatpush3.msra.mxu1 %v915_v17  ;;  %1114 = vmatprep.subr.mxu0 %v266_v18  ;;  %v574_v4 = vld [vmem:[%s1730_s3 + $0x60] sm:$0xff]  ;;  %v956_v5 = vld [vmem:[%s1730_s3 + $0xd8] sm:$0xff]  ;;  %v955_v7 = vld [vmem:[%s1730_s3 + $0xd0] sm:$0xff] }
  0x1f   : > { %1149 = vmatprep.subr.mxu1 %v914_v19  ;;  %1115 = vmatpush3.msra.mxu0 %v266_v18  ;;  %v573_v6 = vld [vmem:[%s1730_s3 + $0x58] sm:$0xff]  ;;  %v572_v8 = vld [vmem:[%s1730_s3 + $0x50] sm:$0xff]  ;;  %v954_v9 = vld [vmem:[%s1730_s3 + $0xc8] sm:$0xff] }
  0x20   : > { %1150 = vmatpush3.msra.mxu1 %v914_v19  ;;  %1116 = vmatprep.subr.mxu0 %v265_v20  ;;  %v571_v10 = vld [vmem:[%s1730_s3 + $0x48] sm:$0xff]  ;;  %v953_v11 = vld [vmem:[%s1730_s3 + $0xc0] sm:$0xff]  ;;  %v952_v13 = vld [vmem:[%s1730_s3 + $0xb8] sm:$0xff] }
  0x21   : > { %1151 = vmatprep.subr.mxu1 %v913_v21  ;;  %1117 = vmatpush3.msra.mxu0 %v265_v20  ;;  %v570_v12 = vld [vmem:[%s1730_s3 + $0x40] sm:$0xff]  ;;  %v569_v14 = vld [vmem:[%s1730_s3 + $0x38] sm:$0xff]  ;;  %v951_v15 = vld [vmem:[%s1730_s3 + $0xb0] sm:$0xff] }
  0x22   : > { %1152 = vmatpush3.msra.mxu1 %v913_v21  ;;  %1118 = vmatprep.subr.mxu0 %v264_v23  ;;  %v568_v16 = vld [vmem:[%s1730_s3 + $0x30] sm:$0xff]  ;;  %v950_v17 = vld [vmem:[%s1730_s3 + $0xa8] sm:$0xff]  ;;  %v949_v19 = vld [vmem:[%s1730_s3 + $0xa0] sm:$0xff] }
  0x23   : > { %1153 = vmatprep.subr.mxu1 %v912_v24  ;;  %1119 = vmatpush3.msra.mxu0 %v264_v23  ;;  %v567_v18 = vld [vmem:[%s1730_s3 + $0x28] sm:$0xff]  ;;  %v566_v20 = vld [vmem:[%s1730_s3 + $0x20] sm:$0xff]  ;;  %v948_v21 = vld [vmem:[%s1730_s3 + $0x98] sm:$0xff] }
  0x24   : > { %1154 = vmatpush3.msra.mxu1 %v912_v24  ;;  %1120 = vmatprep.subr.mxu0 %v263_v25  ;;  %v565_v22 = vld [vmem:[%s1730_s3 + $0x18] sm:$0xff]  ;;  %v947_v23 = vld [vmem:[%s1730_s3 + $0x90] sm:$0xff]  ;;  %v944_v38 = vld [vmem:[%s1729_s2] ss:$0 sm:$0xff] }
  0x25   : > { %1155 = vmatprep.subr.mxu1 %v911_v26  ;;  %1121 = vmatpush3.msra.mxu0 %v263_v25  ;;  %v564_v24 = vld [vmem:[%s1730_s3 + $0x10] sm:$0xff]  ;;  %v946_v25 = vld [vmem:[%s1730_s3 + $0x88] sm:$0xff]  ;;  %v978_v32 = vld [vmem:[%s1730_s3 + $0x178] sm:$0xff] }
  0x26   : > { %1156 = vmatpush3.msra.mxu1 %v911_v26  ;;  %1122 = vmatprep.subr.mxu0 %v262_v30  ;;  %v563_v26 = vld [vmem:[%s1730_s3 + $0x8] sm:$0xff] }
  0x27   : > { %1157 = vmatprep.subr.mxu1 %v910_v31  ;;  %1123 = vmatpush3.msra.mxu0 %v262_v30  ;;  %v945_v30 = vld [vmem:[%s1730_s3 + $0x80] sm:$0xff] }
  0x28   : > { %1158 = vmatpush3.msra.mxu1 %v910_v31  ;;  %1124 = vmatprep.subr.mxu0 %v261_v34  ;;  %v562_v31 = vld [vmem:[%s1730_s3] sm:$0xff] }
  0x29   : > { %1159 = vmatprep.subr.mxu1 %v909_v35  ;;  %1125 = vmatpush3.msra.mxu0 %v261_v34 }
  0x2a   : > { %1160 = vmatpush3.msra.mxu1 %v909_v35  ;;  %1126 = vmatprep.subr.mxu0 %v260_v36 }
  0x2b   : > { %1161 = vmatprep.subr.mxu1 %v908_v37  ;;  %1127 = vmatpush3.msra.mxu0 %v260_v36 }
  0x2c   : > { %1128 = vmatprep.mubr.msk.f32.mxu0 %vm986_vm1, %v257_v40  ;;  %1162 = vmatpush3.msra.mxu1 %v908_v37 }
  0x2d   : > { %1163 = vmatprep.mubr.f32.mxu1 %v1450_v27  ;;  %1129 = vmatmul.mubr.f32.vlgmr.msra.gmra.mxu0 %v256_v41 }
  0x2e   : > { %1164 = vmatmul.mubr.f32.vlgmr.msra.gmra.mxu1 %v1452_v28  ;;  %1166 = vmatprep.subr.mxu0 %v941_v42 }
  0x2f   : > { %1198 = vmatprep.mubr.f32.mxu0 %v429_v43  ;;  %1167 = vmatpush3.msra.mxu0 %v941_v42 }
  0x30   : > { %1168 = vmatprep.subr.mxu0 %v940_v44  ;;  %1201 = vmatprep.subr.mxu1 %v577_v62 }
  0x31   : > { %1169 = vmatpush3.msra.mxu0 %v940_v44  ;;  %1202 = vmatpush3.msra.mxu1 %v577_v62  ;;  %v971_v62 = vld [vmem:[%s1730_s3 + $0x140] sm:$0xff] }
  0x32   : > { %1170 = vmatprep.subr.mxu0 %v939_v45  ;;  %1203 = vmatprep.subr.mxu1 %v576_v0 }
  0x33   : > { %1171 = vmatpush3.msra.mxu0 %v939_v45  ;;  %1204 = vmatpush3.msra.mxu1 %v576_v0  ;;  %v969_v0 = vld [vmem:[%s1730_s3 + $0x130] sm:$0xff] }
  0x34   : > { %1172 = vmatprep.subr.mxu0 %v938_v46  ;;  %1205 = vmatprep.subr.mxu1 %v575_v2 }
  0x35   : > { %1173 = vmatpush3.msra.mxu0 %v938_v46  ;;  %1206 = vmatpush3.msra.mxu1 %v575_v2  ;;  %v967_v2 = vld [vmem:[%s1730_s3 + $0x120] sm:$0xff] }
  0x36   : > { %1174 = vmatprep.subr.mxu0 %v937_v47  ;;  %1207 = vmatprep.subr.mxu1 %v574_v4 }
  0x37   : > { %1175 = vmatpush3.msra.mxu0 %v937_v47  ;;  %1208 = vmatpush3.msra.mxu1 %v574_v4  ;;  %v965_v4 = vld [vmem:[%s1730_s3 + $0x110] sm:$0xff] }
  0x38   : > { %1176 = vmatprep.subr.mxu0 %v936_v48  ;;  %1209 = vmatprep.subr.mxu1 %v573_v6 }
  0x39   : > { %1177 = vmatpush3.msra.mxu0 %v936_v48  ;;  %1210 = vmatpush3.msra.mxu1 %v573_v6  ;;  %v963_v6 = vld [vmem:[%s1730_s3 + $0x100] sm:$0xff] }
  0x3a   : > { %1178 = vmatprep.subr.mxu0 %v935_v49  ;;  %1211 = vmatprep.subr.mxu1 %v572_v8 }
  0x3b   : > { %1179 = vmatpush3.msra.mxu0 %v935_v49  ;;  %1212 = vmatpush3.msra.mxu1 %v572_v8 }
  0x3c   : > { %1180 = vmatprep.subr.mxu0 %v934_v50  ;;  %1213 = vmatprep.subr.mxu1 %v571_v10 }
  0x3d   : > { %1181 = vmatpush3.msra.mxu0 %v934_v50  ;;  %1214 = vmatpush3.msra.mxu1 %v571_v10 }
  0x3e   : > { %1182 = vmatprep.subr.mxu0 %v933_v51  ;;  %1215 = vmatprep.subr.mxu1 %v570_v12 }
  0x3f   : > { %1183 = vmatpush3.msra.mxu0 %v933_v51  ;;  %1216 = vmatpush3.msra.mxu1 %v570_v12 }
  0x40   : > { %1184 = vmatprep.subr.mxu0 %v932_v52  ;;  %1217 = vmatprep.subr.mxu1 %v569_v14 }
  0x41   : > { %1185 = vmatpush3.msra.mxu0 %v932_v52  ;;  %1218 = vmatpush3.msra.mxu1 %v569_v14 }
  0x42   : > { %1186 = vmatprep.subr.mxu0 %v931_v53  ;;  %1219 = vmatprep.subr.mxu1 %v568_v16 }
  0x43   : > { %1187 = vmatpush3.msra.mxu0 %v931_v53  ;;  %1220 = vmatpush3.msra.mxu1 %v568_v16 }
  0x44   : > { %1188 = vmatprep.subr.mxu0 %v930_v54  ;;  %1221 = vmatprep.subr.mxu1 %v567_v18 }
  0x45   : > { %1189 = vmatpush3.msra.mxu0 %v930_v54  ;;  %1222 = vmatpush3.msra.mxu1 %v567_v18  ;;  %v977_v54 = vld [vmem:[%s1730_s3 + $0x170] sm:$0xff] }
  0x46   : > { %1190 = vmatprep.subr.mxu0 %v929_v55  ;;  %1223 = vmatprep.subr.mxu1 %v566_v20 }
  0x47   : > { %1191 = vmatpush3.msra.mxu0 %v929_v55  ;;  %1224 = vmatpush3.msra.mxu1 %v566_v20 }
  0x48   : > { %1192 = vmatprep.subr.mxu0 %v928_v56  ;;  %1225 = vmatprep.subr.mxu1 %v565_v22 }
  0x49   : > { %1193 = vmatpush3.msra.mxu0 %v928_v56  ;;  %1226 = vmatpush3.msra.mxu1 %v565_v22  ;;  %v976_v56 = vld [vmem:[%s1730_s3 + $0x168] sm:$0xff] }
  0x4a   : > { %1194 = vmatprep.subr.mxu0 %v927_v57  ;;  %1227 = vmatprep.subr.mxu1 %v564_v24 }
  0x4b   : > { %1195 = vmatpush3.msra.mxu0 %v927_v57  ;;  %1228 = vmatpush3.msra.mxu1 %v564_v24  ;;  %v975_v57 = vld [vmem:[%s1730_s3 + $0x160] sm:$0xff] }
  0x4c   : > { %1196 = vmatprep.subr.mxu0 %v926_v59  ;;  %1229 = vmatprep.subr.mxu1 %v563_v26 }
  0x4d   : > { %1197 = vmatpush3.msra.mxu0 %v926_v59  ;;  %1230 = vmatpush3.msra.mxu1 %v563_v26  ;;  %v974_v59 = vld [vmem:[%s1730_s3 + $0x158] sm:$0xff] }
  0x4e   : > { %1199 = vmatmul.mubr.msk.f32.vlgmr.msra.gmra.mxu0 %vm987_vm3, %v430_v60  ;;  %1236 = vmatprep.subr.mxu0 %v960_v61  ;;  %v973_v60 = vld [vmem:[%s1730_s3 + $0x150] sm:$0xff] }
  0x4f   : > { %1237 = vmatpush3.msra.mxu0 %v960_v61  ;;  %1231 = vmatprep.subr.mxu1 %v562_v31  ;;  %v972_v61 = vld [vmem:[%s1730_s3 + $0x148] sm:$0xff] }
  0x50   : > { %1238 = vmatprep.subr.mxu0 %v959_v63  ;;  %1232 = vmatpush3.msra.mxu1 %v562_v31 }
  0x51   : > { %1239 = vmatpush3.msra.mxu0 %v959_v63  ;;  %1271 = vmatprep.subr.mxu1 %v978_v32  ;;  %v970_v63 = vld [vmem:[%s1730_s3 + $0x138] sm:$0xff] }
  0x52   : > { %1240 = vmatprep.subr.mxu0 %v958_v1 }
  0x53   : > { %1241 = vmatpush3.msra.mxu0 %v958_v1  ;;  %v968_v1 = vld [vmem:[%s1730_s3 + $0x128] sm:$0xff] }
  0x54   : > { %1242 = vmatprep.subr.mxu0 %v957_v3 }
  0x55   : > { %1243 = vmatpush3.msra.mxu0 %v957_v3  ;;  %v966_v3 = vld [vmem:[%s1730_s3 + $0x118] sm:$0xff] }
  0x56   : > { %1244 = vmatprep.subr.mxu0 %v956_v5 }
  0x57   : > { %1245 = vmatpush3.msra.mxu0 %v956_v5  ;;  %v964_v5 = vld [vmem:[%s1730_s3 + $0x108] sm:$0xff] }
  0x58   : > { %1246 = vmatprep.subr.mxu0 %v955_v7 }
  0x59   : > { %1247 = vmatpush3.msra.mxu0 %v955_v7 }
  0x5a   : > { %1248 = vmatprep.subr.mxu0 %v954_v9 }
  0x5b   : > { %1249 = vmatpush3.msra.mxu0 %v954_v9 }
  0x5c   : > { %1250 = vmatprep.subr.mxu0 %v953_v11 }
  0x5d   : > { %1251 = vmatpush3.msra.mxu0 %v953_v11 }
  0x5e   : > { %1252 = vmatprep.subr.mxu0 %v952_v13 }
  0x5f   : > { %1253 = vmatpush3.msra.mxu0 %v952_v13  ;;  %v981_v13 = vld [vmem:[%s1731_s4] ss:$0 sm:$0xff] }
  0x60   : > { %1254 = vmatprep.subr.mxu0 %v951_v15 }
  0x61   : > { %1255 = vmatpush3.msra.mxu0 %v951_v15 }
  0x62   : > { %1256 = vmatprep.subr.mxu0 %v950_v17 }
  0x63   : > { %1257 = vmatpush3.msra.mxu0 %v950_v17 }
  0x64   : > { %1258 = vmatprep.subr.mxu0 %v949_v19 }
  0x65   : > { %1259 = vmatpush3.msra.mxu0 %v949_v19 }
  0x66   : > { %1260 = vmatprep.subr.mxu0 %v948_v21 }
  0x67   : > { %1261 = vmatpush3.msra.mxu0 %v948_v21 }
  0x68   : > { %1262 = vmatprep.subr.mxu0 %v947_v23 }
  0x69   : > { %1263 = vmatpush3.msra.mxu0 %v947_v23 }
  0x6a   : > { %1264 = vmatprep.subr.mxu0 %v946_v25 }
  0x6b   : > { %1265 = vmatpush3.msra.mxu0 %v946_v25 }
  0x6c   : > { %1266 = vmatprep.subr.mxu0 %v945_v30 }
  0x6d   : > { %1267 = vmatpush3.msra.mxu0 %v945_v30 }
  0xed   : > { %v1130_v33 = vpop.f32.mrf.mxu0 }
  0xee   : > { %v1165_v34 = vpop.f32.mrf.mxu1 }
  0xef   : > { %v342_v35 = vpop.f32.mrf.mxu0  ;;  %v423_v37 = vadd.f32 %v1165_v34, %v1130_v33 }
  0xf0   : > { %v417_v36 = vpop.f32.mrf.mxu1 }
  0xf1   : > { %v418_v40 = vadd.f32 %v417_v36, %v342_v35 }
 0x10e   : > { %v1200_v39 = vpop.f32.mrf.mxu0 }
 0x10f   : > { %v526_v41 = vadd.f32 %v1200_v39, %v423_v37 }
 0x110   : > { %v516_v42 = vpop.f32.mrf.mxu0 }
 0x111   : > { %vm528_vm4 = vcmp.gt.f32.partialorder %v526_v41, 0.0  ;;  %v536_v43 = vmul.f32 %v944_v38, %v526_v41  ;;  %v525_v44 = vadd.f32 %v516_v42, %v418_v40 }
 0x113   : > { %v535_v45 = vmul.f32 %v944_v38, %v525_v44  ;;  %vm527_vm5 = vcmp.gt.f32.partialorder %v525_v44, 0.0  ;;  %v538_v46 = vsel %vm528_vm4, %v526_v41, %v536_v43 }
 0x114   : > { %v557_v50 = vrot.slane %v538_v46, 7  ;;  %v729_v51 = vrot.slane %v538_v46, 1 }
 0x115   : > { %v537_v47 = vsel %vm527_vm5, %v525_v44, %v535_v45 }
 0x116   : > { %v556_v48 = vrot.slane %v537_v47, 7  ;;  %1268 = vmatprep.mubr.f32.mxu0 %v537_v47  ;;  %v728_v49 = vrot.slane %v537_v47, 1 }
 0x117   : > { %1269 = vmatmul.mubr.f32.vlgmr.msra.gmra.mxu0 %v538_v46 }
 0x118   : > { %v559_v52 = vsel %vm255_vm0, %v557_v50, %v556_v48  ;;  %v558_v53 = vsel %vm255_vm0, %v556_v48, %v557_v50  ;;  %v730_v55 = vsel %vm428_vm2, %v728_v49, %v729_v51  ;;  %v731_v7 = vsel %vm428_vm2, %v729_v51, %v728_v49 }
 0x119   : > { %1233 = vmatprep.mubr.msk.f32.mxu1 %vm986_vm1, %v559_v52 }
 0x11a   : > { %1234 = vmatmul.mubr.f32.vlgmr.msra.gmra.mxu1 %v558_v53 }
 0x11b   : > { %1272 = vmatpush3.msra.mxu1 %v978_v32  ;;  %1303 = vmatprep.mubr.f32.mxu1 %v730_v55 }
 0x11c   : > { %1273 = vmatprep.subr.mxu1 %v977_v54 }
 0x11d   : > { %1274 = vmatpush3.msra.mxu1 %v977_v54 }
 0x11e   : > { %1275 = vmatprep.subr.mxu1 %v976_v56 }
 0x11f   : > { %1276 = vmatpush3.msra.mxu1 %v976_v56 }
 0x120   : > { %1277 = vmatprep.subr.mxu1 %v975_v57 }
 0x121   : > { %1278 = vmatpush3.msra.mxu1 %v975_v57 }
 0x122   : > { %1279 = vmatprep.subr.mxu1 %v974_v59 }
 0x123   : > { %1280 = vmatpush3.msra.mxu1 %v974_v59 }
 0x124   : > { %1281 = vmatprep.subr.mxu1 %v973_v60 }
 0x125   : > { %1282 = vmatpush3.msra.mxu1 %v973_v60 }
 0x126   : > { %1283 = vmatprep.subr.mxu1 %v972_v61 }
 0x127   : > { %1284 = vmatpush3.msra.mxu1 %v972_v61 }
 0x128   : > { %1285 = vmatprep.subr.mxu1 %v971_v62 }
 0x129   : > { %1286 = vmatpush3.msra.mxu1 %v971_v62 }
 0x12a   : > { %1287 = vmatprep.subr.mxu1 %v970_v63 }
 0x12b   : > { %1288 = vmatpush3.msra.mxu1 %v970_v63 }
 0x12c   : > { %1289 = vmatprep.subr.mxu1 %v969_v0 }
 0x12d   : > { %1290 = vmatpush3.msra.mxu1 %v969_v0 }
 0x12e   : > { %1291 = vmatprep.subr.mxu1 %v968_v1 }
 0x12f   : > { %1292 = vmatpush3.msra.mxu1 %v968_v1 }
 0x130   : > { %1293 = vmatprep.subr.mxu1 %v967_v2 }
 0x131   : > { %1294 = vmatpush3.msra.mxu1 %v967_v2 }
 0x132   : > { %1295 = vmatprep.subr.mxu1 %v966_v3 }
 0x133   : > { %1296 = vmatpush3.msra.mxu1 %v966_v3 }
 0x134   : > { %1297 = vmatprep.subr.mxu1 %v965_v4 }
 0x135   : > { %1298 = vmatpush3.msra.mxu1 %v965_v4 }
 0x136   : > { %1299 = vmatprep.subr.mxu1 %v964_v5 }
 0x137   : > { %1300 = vmatpush3.msra.mxu1 %v964_v5 }
 0x138   : > { %1301 = vmatprep.subr.mxu1 %v963_v6 }
 0x139   : > { %1302 = vmatpush3.msra.mxu1 %v963_v6 }
 0x13a   : > { %1304 = vmatmul.mubr.msk.f32.vlgmr.msra.gmra.mxu1 %vm987_vm3, %v731_v7 }
 0x1d7   : > { %v1270_v9 = vpop.f32.mrf.mxu0 }
 0x1d9   : > { %v719_v12 = vpop.f32.mrf.mxu0 }
 0x1da   : > { %v1235_v8 = vpop.f32.mrf.mxu1 }
 0x1db   : > { %v725_v11 = vadd.f32 %v1270_v9, %v1235_v8 }
 0x1dc   : > { %v644_v10 = vpop.f32.mrf.mxu1 }
 0x1dd   : > { %v720_v15 = vadd.f32 %v719_v12, %v644_v10 }
 0x1fa   : > { %v1305_v14 = vpop.f32.mrf.mxu1 }
 0x1fb   : > { %v827_v16 = vadd.f32 %v1305_v14, %v725_v11 }
 0x1fc   : > { %v817_v17 = vpop.f32.mrf.mxu1 }
 0x1fd   : > { %vm829_vm6 = vcmp.gt.f32.partialorder %v827_v16, 0.0  ;;  %v837_v29 = vmul.f32 %v981_v13, %v827_v16  ;;  %v826_v18 = vadd.f32 %v817_v17, %v720_v15 }
 0x1ff   : > { %v839_v58 = vsel %vm829_vm6, %v827_v16, %v837_v29  ;;  %vm828_vm7 = vcmp.gt.f32.partialorder %v826_v18, 0.0  ;;  %v836_v19 = vmul.f32 %v981_v13, %v826_v18 }
 0x200   : > { %v841_v20 = vadd.f32 %v839_v58, %v1452_v28 }
 0x201   : > { %v838_v21 = vsel %vm828_vm7, %v826_v18, %v836_v19 }
 0x202   : > { %843 = vst [vmem:[%s224_s22 + $0x8] sm:$0xff] %v841_v20  ;;  %v840_v22 = vadd.f32 %v838_v21, %v1450_v27 }
 0x204   : > { %842 = vst [vmem:[%s224_s22] sm:$0xff] %v840_v22 }
 0x205 PF: > { %s15_s18 = sadd.s32 1, %s1320_s18  }
 0x206   : > { %p12_p4 = scmp.ge.s32.totalorder %s15_s18, 4  }
 0x208   :  { %14 = sbr.rel (!%p12_p4) target bundleno = 1 (0x1), region = 74 }

</bundles_post_ra>
